<compile_context>
chip_gen: v7x
topology: tpu7x:2x2x1
jax: 0.10.0
libtpu: 0.0.40
codegen_flags: <defaults>
</compile_context>

<pallas_src>
import functools
import math

import jax
import jax.numpy as jnp
from jax.experimental import pallas as pl
from jax.experimental.pallas import tpu as pltpu


def output_kernel(h_ref, batch_ref, w_ref, b_ref, out_ref, *, chunk_n):
    i = pl.program_id(1)

    # Output block index is constant over the inner 'arbitrary' axis -> it stays
    # VMEM-resident and acts as the accumulator directly (no scratch, no final copy).
    @pl.when(i == 0)
    def _init():
        out_ref[...] = jnp.zeros_like(out_ref)

    tile_n = h_ref.shape[0]
    g_pad = out_ref.shape[2]
    n_chunks = tile_n // chunk_n

    # Hoisted invariants: folded weight row, SMEM bias scalar, (1, G_pad) graph iota.
    w = w_ref[...].astype(jnp.float32)                       # (1, H)
    b = b_ref[0]                                             # scalar from SMEM
    iota_g = jax.lax.broadcasted_iota(jnp.int32, (1, g_pad), 1)

    def chunk_body(c, acc):
        off = pl.multiple_of(c * chunk_n, chunk_n)
        # per-chunk load keeps the live working set small (~16 vregs at chunk=128,
        # g_pad=128) even for very large node tiles.
        h_c = h_ref[pl.ds(off, chunk_n), :].astype(jnp.float32)   # (CHUNK, H) f32 VPU
        z1_c = jnp.sum(h_c * w, axis=-1, keepdims=True) + b       # (CHUNK, 1)
        seg_c = batch_ref[pl.ds(off, chunk_n), :]                 # (CHUNK, 1); -1 = pad
        # select instead of one-hot multiply: no cast, no mul; pad rows select 0.
        contrib = jnp.where(iota_g == seg_c, z1_c, 0.0)           # (CHUNK, G_pad)
        # vreg-wise partial reduce: keep 8 sublanes; 8->1 collapse happens once in
        # the wrapper, not per tile (no per-tile XLU cross-sublane reduce).
        return acc + jnp.sum(contrib.reshape(chunk_n // 8, 8, g_pad), axis=0)

    partial8 = jax.lax.fori_loop(
        0, n_chunks, chunk_body,
        jnp.zeros((8, g_pad), jnp.float32),
        unroll=min(n_chunks, 8))

    out_ref[...] += partial8[None, :, :]


def _pick_tile_n(hidden, itemsize):
    """Size the node tile from VMEM capacity (generation-aware), capped at 8192."""
    vmem_bytes = 64 << 20  # conservative fallback (v7x per-TC physical VMEM)
    try:
        info = pltpu.get_tpu_info()
        vmem_bytes = int(getattr(info, "vmem_capacity_bytes", vmem_bytes))
    except Exception:
        pass
    budget = vmem_bytes // 8                     # headroom: double-buffered h + output
    tn = budget // (2 * max(hidden, 1) * itemsize)
    tn = int(max(256, min(8192, tn)))
    return max(128, (tn // 128) * 128)


def output_module_forward(h, batch, params, num_graphs, *, tile_n=None, num_splits=1):
    """h: [N, H] node features (pass bf16 to halve HBM traffic; upcast in-kernel),
    batch: [N] int32 graph id per node.  Returns energies [num_graphs].
    num_splits=1 for single-TC v5e/v6e; num_splits=2 shards node tiles across the
    two TensorCores on v7x."""
    N, H = h.shape

    # ---- fold the two activation-free Linears + energy scale (see TODO above) ----
    w0 = params["w0"].astype(jnp.float32)
    b0 = params["b0"].astype(jnp.float32)
    w1 = params["w1"].astype(jnp.float32)
    b1 = params["b1"].astype(jnp.float32)
    w_eff = w0 @ w1                                        # (H, 1)
    b_eff = b0 @ w1 + b1                                   # (1, 1)
    scale = params["scale"].reshape(-1)[0]
    shift = params["shift"].reshape(-1)[0]
    w_row = (w_eff * scale).reshape(1, H).astype(jnp.float32)   # (1, H)
    b_s = (b_eff * scale).reshape(1).astype(jnp.float32)        # (1,) -> SMEM

    # ---- tile sizing (bf16 sublane packing => tile_n multiple of 16) ----
    if tile_n is None:
        tile_n = _pick_tile_n(H, jnp.dtype(h.dtype).itemsize)
    tile_n = max(16, (tile_n // 16) * 16)
    chunk_n = math.gcd(tile_n, 128)                        # <=128 rows, divides tile_n

    # ---- pad graph axis to a lane-dense width (multiple of 128) ----
    g_pad = ((max(num_graphs, 1) + 127) // 128) * 128

    # ---- pad node axis so tiles split evenly across num_splits ----
    tiles_total = max(num_splits, pl.cdiv(N, tile_n))
    tiles_total = ((tiles_total + num_splits - 1) // num_splits) * num_splits
    tiles_per_split = tiles_total // num_splits
    n_pad = tiles_total * tile_n

    h_p = jnp.pad(h, ((0, n_pad - N), (0, 0)))
    batch_p = jnp.pad(batch.astype(jnp.int32), (0, n_pad - N),
                      constant_values=-1).reshape(n_pad, 1)    # -1 => masked out

    kernel = functools.partial(output_kernel, chunk_n=chunk_n)

    out = pl.pallas_call(
        kernel,
        out_shape=jax.ShapeDtypeStruct((num_splits, 8, g_pad), jnp.float32),
        grid=(num_splits, tiles_per_split),
        in_specs=[
            # node-tiled h stream (double-buffered by Pallas); H < 128 wastes lanes but
            # the G_pad-wide scatter dominates, so no repacking attempted here.
            pl.BlockSpec((tile_n, H), lambda c, i: (c * tiles_per_split + i, 0)),
            # per-node graph ids, node axis on sublanes to match h
            pl.BlockSpec((tile_n, 1), lambda c, i: (c * tiles_per_split + i, 0)),
            # folded weight row, resident across the whole grid
            pl.BlockSpec((1, H), lambda c, i: (0, 0)),
            # folded bias scalar in SMEM
            pl.BlockSpec(memory_space=pltpu.MemorySpace.SMEM),
        ],
        # lane-dense (1, 8, G_pad) output block per split; constant over inner axis.
        out_specs=pl.BlockSpec((1, 8, g_pad), lambda c, i: (c, 0, 0)),
        compiler_params=pltpu.CompilerParams(
            dimension_semantics=("parallel", "arbitrary"),
            vmem_limit_bytes=32 * 1024 * 1024,   # fits scoped VMEM on v5e/v6e/v7x
        ),
    )(h_p, batch_p, w_row, b_s)

    # collapse per-split partials AND the 8 sublane partials once, here; shift once.
    pooled = jnp.sum(out[:, :, :num_graphs], axis=(0, 1))        # (G,)
    return pooled + shift


def reference_forward(h, batch, params, num_graphs):
    """Pure-JAX reference (un-folded two-Linear path) for correctness check."""
    z0 = h @ params["w0"] + params["b0"]
    z1 = z0 @ params["w1"] + params["b1"]          # (N, 1)
    s = z1[:, 0]                                   # squeeze(-1)
    pooled = jax.ops.segment_sum(s, batch, num_segments=num_graphs)
    return pooled * params["scale"][0, 0] + params["shift"][0, 0]


if __name__ == "__main__":
    # Shapes consistent with the module: hidden=32, hidden//2=16, num_targets=1,
    # 3 graphs.  N=600 with tile_n=256 / num_splits=2 exercises node padding,
    # multi-tile accumulation, the per-split partial sums, and the chunked scatter
    # (2 chunks per tile).  h is bf16 per the streaming contract.
    N, H, H2, G = 600, 32, 16, 3

    key = jax.random.PRNGKey(0)
    k_h, k_w0, k_b0, k_w1, k_b1 = jax.random.split(key, 5)

    h = jax.random.normal(k_h, (N, H), dtype=jnp.float32).astype(jnp.bfloat16)
    batch = jnp.concatenate([
        jnp.zeros((250,), jnp.int32),
        jnp.ones((200,), jnp.int32),
        jnp.full((150,), 2, jnp.int32),
    ])  # graph index per node (sorted, uneven sizes)

    params = {
        "w0": jax.random.normal(k_w0, (H, H2), dtype=jnp.float32) * 0.1,
        "b0": jax.random.normal(k_b0, (1, H2), dtype=jnp.float32) * 0.1,
        "w1": jax.random.normal(k_w1, (H2, 1), dtype=jnp.float32) * 0.1,
        "b1": jax.random.normal(k_b1, (1, 1), dtype=jnp.float32) * 0.1,
        # energy_scaling_coeff / energy_shifting_coeff buffers (num_targets=1)
        "scale": jnp.array([[2.5]], dtype=jnp.float32),
        "shift": jnp.array([[-1.25]], dtype=jnp.float32),
    }

    ref = reference_forward(h.astype(jnp.float32), batch, params, num_graphs=G)

    # explicit small tiling: multi-split + multi-tile + multi-chunk path
    energies = output_module_forward(h, batch, params, num_graphs=G,
                                     tile_n=256, num_splits=2)
    jax.block_until_ready(energies)
    assert energies.shape == (G,)
    assert jnp.allclose(energies, ref, atol=1e-3, rtol=1e-3), (energies, ref)

    # default (auto VMEM-sized tile, single split for v5e/v6e) path
    energies2 = output_module_forward(h, batch, params, num_graphs=G)
    jax.block_until_ready(energies2)
    assert jnp.allclose(energies2, ref, atol=1e-3, rtol=1e-3), (energies2, ref)

    print("KERNEL_OK")
</pallas_src>

<mosaic_0001>
module attributes {stable_mosaic.version = 11 : i64} {
  func.func @output_kernel(%arg0: i32, %arg1: i32, %arg2: memref<256x32xbf16, #tpu.memory_space<vmem>>, %arg3: memref<256x1xi32, #tpu.memory_space<vmem>>, %arg4: memref<1x32xf32, #tpu.memory_space<vmem>>, %arg5: memref<1xf32, #tpu.memory_space<smem>>, %arg6: memref<1x8x128xf32, #tpu.memory_space<vmem>>) attributes {dimension_semantics = [#tpu.dimension_semantics<parallel>, #tpu.dimension_semantics<arbitrary>], iteration_bounds = array<i64: 2, 2>, scalar_prefetch = 0 : i64, scratch_operands = 0 : i64, tpu.core_type = #tpu.core_type<tc>, window_params = [{transform_indices = @transform_0, window_bounds = array<i64: 256, 32>}, {transform_indices = @transform_1, window_bounds = array<i64: 256, 1>}, {pipeline_mode = #tpu.pipeline_mode<synchronous>, transform_indices = @transform_2, window_bounds = array<i64: 1, 32>}, {transform_indices = @transform_3, window_bounds = array<i64: 1>}, {transform_indices = @transform_4, window_bounds = array<i64: 1, 8, 128>}]} {
    %c0_i32 = arith.constant 0 : i32
    %0 = arith.cmpi eq, %arg1, %c0_i32 : i32
    %1 = arith.extui %0 : i1 to i32
    %c0_i32_0 = arith.constant 0 : i32
    %2 = arith.cmpi ne, %1, %c0_i32_0 : i32
    scf.if %2 {
      %cst_21 = arith.constant 0.000000e+00 : f32
      %57 = vector.broadcast %cst_21 : f32 to vector<1x8x128xf32>
      %c0_22 = arith.constant 0 : index
      %c0_23 = arith.constant 0 : index
      %c0_24 = arith.constant 0 : index
      %58 = vector.load %arg6[%c0_22, %c0_23, %c0_24] : memref<1x8x128xf32, #tpu.memory_space<vmem>>, vector<1x8x128xf32>
      tpu.vector_store %arg6[%c0_22, %c0_23, %c0_24], %57 {strides = array<i32>} : memref<1x8x128xf32, #tpu.memory_space<vmem>>, vector<1x8x128xf32>,
    } else {
    }
    %c0 = arith.constant 0 : index
    %c0_1 = arith.constant 0 : index
    %3 = vector.load %arg4[%c0, %c0_1] : memref<1x32xf32, #tpu.memory_space<vmem>>, vector<1x32xf32>
    %c0_2 = arith.constant 0 : index
    %4 = memref.load %arg5[%c0_2] : memref<1xf32, #tpu.memory_space<smem>>
    %5 = tpu.iota {dimensions = array<i32: 1>} : vector<1x128xi32>
    %cst = arith.constant 0.000000e+00 : f32
    %6 = vector.broadcast %cst : f32 to vector<8x128xf32>
    %c0_i32_3 = arith.constant 0 : i32
    %c128_i32 = arith.constant 128 : i32
    %7 = arith.muli %c0_i32_3, %c128_i32 : i32
    %8 = tpu.assume_multiple %7, 128 : i32
    %9 = arith.index_cast %8 : i32 to index
    %c0_4 = arith.constant 0 : index
    %10 = vector.load %arg2[%9, %c0_4] : memref<256x32xbf16, #tpu.memory_space<vmem>>, vector<128x32xbf16>
    %11 = arith.extf %10 : vector<128x32xbf16> to vector<128x32xf32>
    %12 = vector.broadcast %3 : vector<1x32xf32> to vector<128x32xf32>
    %13 = arith.mulf %11, %12 : vector<128x32xf32>
    %cst_5 = arith.constant dense<0.000000e+00> : vector<128xf32>
    %14 = vector.multi_reduction <add>, %13, %cst_5 [1] : vector<128x32xf32> to vector<128xf32>
    %15 = vector.shape_cast %14 : vector<128xf32> to vector<128x1xf32>
    %16 = vector.broadcast %4 : f32 to vector<128x1xf32>
    %17 = arith.addf %15, %16 : vector<128x1xf32>
    %18 = arith.index_cast %8 : i32 to index
    %c0_6 = arith.constant 0 : index
    %19 = vector.load %arg3[%18, %c0_6] : memref<256x1xi32, #tpu.memory_space<vmem>>, vector<128x1xi32>
    %20 = vector.broadcast %5 : vector<1x128xi32> to vector<128x128xi32>
    %21 = vector.broadcast %19 : vector<128x1xi32> to vector<128x128xi32>
    %22 = arith.cmpi eq, %20, %21 : vector<128x128xi32>
    %cst_7 = arith.constant 0.000000e+00 : f32
    %23 = vector.shape_cast %17 : vector<128x1xf32> to vector<128x1xf32>
    %24 = vector.broadcast %23 : vector<128x1xf32> to vector<128x128xf32>
    %25 = vector.broadcast %cst_7 : f32 to vector<128x128xf32>
    %26 = arith.select %22, %24, %25 : vector<128x128xi1>, vector<128x128xf32>
    %27 = vector.shape_cast %26 : vector<128x128xf32> to vector<16x8x128xf32>
    %cst_8 = arith.constant dense<0.000000e+00> : vector<8x128xf32>
    %28 = vector.multi_reduction <add>, %27, %cst_8 [0] : vector<16x8x128xf32> to vector<8x128xf32>
    %29 = arith.addf %6, %28 : vector<8x128xf32>
    %c1_i32 = arith.constant 1 : i32
    %c128_i32_9 = arith.constant 128 : i32
    %30 = arith.muli %c1_i32, %c128_i32_9 : i32
    %31 = tpu.assume_multiple %30, 128 : i32
    %32 = arith.index_cast %31 : i32 to index
    %c0_10 = arith.constant 0 : index
    %33 = vector.load %arg2[%32, %c0_10] : memref<256x32xbf16, #tpu.memory_space<vmem>>, vector<128x32xbf16>
    %34 = arith.extf %33 : vector<128x32xbf16> to vector<128x32xf32>
    %35 = vector.broadcast %3 : vector<1x32xf32> to vector<128x32xf32>
    %36 = arith.mulf %34, %35 : vector<128x32xf32>
    %cst_11 = arith.constant dense<0.000000e+00> : vector<128xf32>
    %37 = vector.multi_reduction <add>, %36, %cst_11 [1] : vector<128x32xf32> to vector<128xf32>
    %38 = vector.shape_cast %37 : vector<128xf32> to vector<128x1xf32>
    %39 = vector.broadcast %4 : f32 to vector<128x1xf32>
    %40 = arith.addf %38, %39 : vector<128x1xf32>
    %41 = arith.index_cast %31 : i32 to index
    %c0_12 = arith.constant 0 : index
    %42 = vector.load %arg3[%41, %c0_12] : memref<256x1xi32, #tpu.memory_space<vmem>>, vector<128x1xi32>
    %43 = vector.broadcast %5 : vector<1x128xi32> to vector<128x128xi32>
    %44 = vector.broadcast %42 : vector<128x1xi32> to vector<128x128xi32>
    %45 = arith.cmpi eq, %43, %44 : vector<128x128xi32>
    %cst_13 = arith.constant 0.000000e+00 : f32
    %46 = vector.shape_cast %40 : vector<128x1xf32> to vector<128x1xf32>
    %47 = vector.broadcast %46 : vector<128x1xf32> to vector<128x128xf32>
    %48 = vector.broadcast %cst_13 : f32 to vector<128x128xf32>
    %49 = arith.select %45, %47, %48 : vector<128x128xi1>, vector<128x128xf32>
    %50 = vector.shape_cast %49 : vector<128x128xf32> to vector<16x8x128xf32>
    %cst_14 = arith.constant dense<0.000000e+00> : vector<8x128xf32>
    %51 = vector.multi_reduction <add>, %50, %cst_14 [0] : vector<16x8x128xf32> to vector<8x128xf32>
    %52 = arith.addf %29, %51 : vector<8x128xf32>
    %c2_i32 = arith.constant 2 : i32
    %c0_15 = arith.constant 0 : index
    %c0_16 = arith.constant 0 : index
    %c0_17 = arith.constant 0 : index
    %53 = vector.load %arg6[%c0_15, %c0_16, %c0_17] : memref<1x8x128xf32, #tpu.memory_space<vmem>>, vector<1x8x128xf32>
    %54 = vector.shape_cast %52 : vector<8x128xf32> to vector<1x8x128xf32>
    %55 = arith.addf %53, %54 : vector<1x8x128xf32>
    %c0_18 = arith.constant 0 : index
    %c0_19 = arith.constant 0 : index
    %c0_20 = arith.constant 0 : index
    %56 = vector.load %arg6[%c0_18, %c0_19, %c0_20] : memref<1x8x128xf32, #tpu.memory_space<vmem>>, vector<1x8x128xf32>
    tpu.vector_store %arg6[%c0_18, %c0_19, %c0_20], %55 {strides = array<i32>} : memref<1x8x128xf32, #tpu.memory_space<vmem>>, vector<1x8x128xf32>,
    return
  }
  func.func @transform_0(%arg0: i32, %arg1: i32) -> (i32, i32) {
    %c2_i32 = arith.constant 2 : i32
    %0 = arith.muli %arg0, %c2_i32 : i32
    %1 = arith.addi %0, %arg1 : i32
    %c0_i32 = arith.constant 0 : i32
    %c0_i32_0 = arith.constant 0 : i32
    return %1, %c0_i32 : i32, i32
  }
  func.func @transform_1(%arg0: i32, %arg1: i32) -> (i32, i32) {
    %c2_i32 = arith.constant 2 : i32
    %0 = arith.muli %arg0, %c2_i32 : i32
    %1 = arith.addi %0, %arg1 : i32
    %c0_i32 = arith.constant 0 : i32
    %c0_i32_0 = arith.constant 0 : i32
    return %1, %c0_i32 : i32, i32
  }
  func.func @transform_2(%arg0: i32, %arg1: i32) -> (i32, i32) {
    %c0_i32 = arith.constant 0 : i32
    %c0_i32_0 = arith.constant 0 : i32
    %c0_i32_1 = arith.constant 0 : i32
    return %c0_i32, %c0_i32_0 : i32, i32
  }
  func.func @transform_3(%arg0: i32, %arg1: i32) -> i32 {
    %c0_i32 = arith.constant 0 : i32
    %c0_i32_0 = arith.constant 0 : i32
    return %c0_i32 : i32
  }
  func.func @transform_4(%arg0: i32, %arg1: i32) -> (i32, i32, i32) {
    %c0_i32 = arith.constant 0 : i32
    %c0_i32_0 = arith.constant 0 : i32
    %c0_i32_1 = arith.constant 0 : i32
    return %arg0, %c0_i32, %c0_i32_0 : i32, i32, i32
  }
}

</mosaic_0001>

<bundles_post_ra>
// kernel: tpu_custom_call.1
= control target key start
LH: loop header
LB: loop body
LE: loop exit
PB: predicated region body
PF: predicated region fallthrough
CT: control target
= control target key end

     0   :  { %s1579_s0 = inlined_call_operand.vmem [shape: bf16[1024,32], index: 0, kind: input, shape index: {}]   ;;  %s1580_s1 = inlined_call_operand.vmem [shape: s32[1024,1], index: 1, kind: input, shape index: {}]   ;;  %s1581_s2 = inlined_call_operand.vmem [shape: f32[1,32], index: 2, kind: input, shape index: {}]   ;;  %s1582_s3 = inlined_call_operand.<no memory space> [shape: f32[1], index: 3, kind: input, shape index: {}]   ;;  %s1583_s4 = inlined_call_operand.hbm [shape: f32[2,8,128], index: 4, kind: output, shape index: {}]  }
   0x1   :  { %9 = sst [smem:[#allocation2]] %s1582_s3 }
   0x2   :  { %10 = vsyncpa [#allocation4], 0 }
   0x3   :  { %12 = vsyncpa [#allocation4 + $0x1], 0  ;;  %s1162_s17 = smov 0   ;;  %s1164_s18 = smov 0  }
   0x4   :  { %s1166_s19 = smov 0   ;;  %s1168_s20 = smov 0  }
   0x5   :  { %s1170_s21 = smov 0   ;;  %s1172_s22 = smov 0  }
   0x6   :  { %s1174_s23 = smov 0   ;;  %s1176_s24 = smov 0  }
   0x7 LB: > { %s827_s3 = sadd.s32 4294967295, %s1129_s24   ;;  %s828_s25 = sadd.s32 4294967294, %s1129_s24   ;;  %s1129_s24 = sphi %s1176_s24, %s18_s24   ;;  %s1125_s23 = sphi %s1174_s23, %s1592_s23   ;;  %s1121_s22 = sphi %s1172_s22, %s1591_s22   ;;  %s1117_s21 = sphi %s1170_s21, %s1590_s21   ;;  %s1113_s20 = sphi %s1168_s20, %s1589_s20   ;;  %s1109_s19 = sphi %s1166_s19, %s1588_s19   ;;  %s1105_s18 = sphi %s1164_s18, %s1587_s18   ;;  %s1101_s17 = sphi %s1162_s17, %s1586_s17  }
   0x8   : > { %s27_s26 = sadd.s32 1, %s1121_s22  ;;  %s30_s27 = sadd.s32 1, %s1125_s23 }
   0x9   : > { %p28_p0 = scmp.ge.s32.totalorder %s27_s26, 2  ;;  %p149_p1 = scmp.ne.s32.totalorder %s1109_s19, %s1105_s18 }
   0xa   : > { %p150_p2 = scmp.eq.s32.totalorder %s827_s3, 3  ;;  %p155_p4 = scmp.ne.s32.totalorder %s1105_s18, %s1101_s17 }
   0xb   : > { %s1594_s26 = smov (%p28_p0, %s27_s26), 0  ;;  %s1596_s27 = smov (!%p28_p0, %s30_s27), %s1125_s23 }
   0xc   : > { %p1211_p3 = por %p150_p2, %p149_p1  ;;  %p32_p5 = scmp.ge.s32.totalorder %s1596_s27, 2 }
   0xd   : > { %p156_p6 = scmp.eq.s32.totalorder %s828_s25, 3  ;;  %p835_p7 = scmp.ge.s32.totalorder %s1129_s24, 1 }
   0xe   : > { %p206_p8 = scmp.lt.s32.totalorder %s1129_s24, 5  ;;  %s1598_s27 = smov (%p32_p5, %s1596_s27), 0 }
   0xf   : > { %p1221_p9 = por %p156_p6, %p155_p4  ;;  %s136_s30 = ssub.s32 %s1125_s23, %s1598_s27 }
  0x10   : > { %p207_p10 = pnand %p835_p7, %p206_p8  ;;  %s139_s5 = sadd.s32 1, %s1109_s19 }
  0x11   : > { %p137_p11 = scmp.eq.s32.totalorder %s136_s30, 0  ;;  %s238_s7 = sand.u32 (!%p207_p10), 1, %s1105_s18  }
  0x12   : > { %210 = sbr.rel (%p207_p10) target bundleno = 372 (0x174), region = 36  ;;  %s837_s8 = sshll.u32 (!%p207_p10), %s1117_s21, 1 }
  0x13   : > { %s1229_s6 = scalar_select %p137_p11, %s1109_s19, %s139_s5  }
  0x14   : > { %s836_s9 = sshll.u32 (!%p207_p10), %s238_s7, 3  ;;  %s242_s10 = sadd.s32 (!%p207_p10), %s1113_s20, %s837_s8 }
  0x15   : > { %s838_s11 = sshll.u32 (!%p207_p10), %s242_s10, 5  ;;  %s1246_s5 = scalar_lea.vmem (!%p207_p10), [#allocation3], %s836_s9 }
  0x16   : > { %p244_p12 = scmp.lt.s32.totalorder (!%p207_p10), %s838_s11, 127  ;;  %p843_p13 = scmp.ne.s32.totalorder (!%p207_p10), %s1113_s20, 0 }
  0x19   : > { %s1600_s11 = smov (!%p244_p12, %s838_s11), 127  ;;  %264 = sbr.rel (%p843_p13) target bundleno = 32 (0x20), region = 40 }
  0x1a   : > { %s839_s12 = sshll.u32 %s1600_s11, 2  ;;  %s842_s13 = sshll.u32 %s1600_s11, 3  ;;  %v1131_v0 = vmov (!%p843_p13), 0.0  }
  0x1b   : > { %s1239_s16 = scalar_lea.vmem %s1579_s0, %s839_s12  ;;  %s1244_s30 = scalar_lea.vmem %s1580_s1, %s842_s13  ;;  %265 = vst [vmem:[%s1246_s5] sm:$0xff] (!%p843_p13), %v1131_v0 }
  0x20 PF: > { %v1253_v1 = vld [vmem:[%s1581_s2] ss:$0 sm:$0xff]  ;;  %v945_v2 = vld [vmem:[%s1239_s16 + $0x8] sm:$0xff]   ;;  %v946_v8 = vld [vmem:[%s1239_s16 + $0x10] sm:$0xff]   ;;  %v1132_v9 = vmov 0   ;;  %vm324_vm0 = vcmask 261120  }
  0x21   : > { %v882_v3 = vld [vmem:[%s1239_s16] sm:$0xff]   ;;  %v887_v4 = vunpack.c.l.bf16 %v945_v2  ;;  %v888_v6 = vunpack.c.h.bf16 %v945_v2  ;;  %1034 = vset.pattern.permute.xlu1 %v1132_v9  ;;  %1033 = vset.pattern.permute.xlu0 %v1132_v9  ;;  %v892_v10 = vunpack.c.h.bf16 %v946_v8  ;;  %v891_v11 = vunpack.c.l.bf16 %v946_v8  ;;  %v947_v16 = vld [vmem:[%s1239_s16 + $0x18] sm:$0xff]   ;;  %v949_v32 = vld [vmem:[%s1239_s16 + $0x28] sm:$0xff]   ;;  %s267_s20 = sld [smem:[#allocation2]]  ;;  %s878_s9 = sshll.u32 %s1117_s21, 7 }
  0x22   : > { %v883_v5 = vunpack.c.l.bf16 %v882_v3  ;;  %v884_v7 = vunpack.c.h.bf16 %v882_v3  ;;  %v896_v19 = vunpack.c.h.bf16 %v947_v16  ;;  %v895_v20 = vunpack.c.l.bf16 %v947_v16  ;;  %v948_v25 = vld [vmem:[%s1239_s16 + $0x20] sm:$0xff]   ;;  %v950_v39 = vld [vmem:[%s1239_s16 + $0x30] sm:$0xff]   ;;  %v951_v46 = vld [vmem:[%s1239_s16 + $0x38] sm:$0xff]   ;;  %s745_s11 = sshll.u32 %s1246_s5, 4  ;;  %s1523_s14 = scalar_lea.hbm %s1583_s4, %s878_s9  ;;  %s1525_s11 = int_to_ptr.vmem [resolvable:$true] %s745_s11 }
  0x23   : > { %v310_v12 = vmul.f32 %v887_v4, %v1253_v1  ;;  %v311_v14 = vmul.f32 %v888_v6, %v1253_v1  ;;  %v313_v23 = vmul.f32 %v892_v10, %v1253_v1  ;;  %v312_v24 = vmul.f32 %v891_v11, %v1253_v1  ;;  %v952_v53 = vld [vmem:[%s1239_s16 + $0x40] sm:$0xff]   ;;  %v953_v60 = vld [vmem:[%s1239_s16 + $0x48] sm:$0xff]   ;;  %v1296_v61 = vld [vmem:[%s1239_s16 + $0x78] sm:$0xff]   ;;  %s732_s15 = scalar_lea.sflag [#allocation4], %s238_s7  ;;  %s1133_s21 = smov [#allocation3]  }
  0x24   : > { %v308_v13 = vmul.f32 %v883_v5, %v1253_v1  ;;  %v309_v15 = vmul.f32 %v884_v7, %v1253_v1  ;;  %v315_v26 = vmul.f32 %v896_v19, %v1253_v1  ;;  %v314_v27 = vmul.f32 %v895_v20, %v1253_v1  ;;  %v954_v6 = vld [vmem:[%s1239_s16 + $0x50] sm:$0xff]   ;;  %s1039_s3 = sshll.u32 %s1133_s21, 4  ;;  %s1040_s3 = int_to_ptr.vmem [resolvable:$false] %s1039_s3 }
  0x25   : > { %v331_v17 = vsel %vm324_vm0, %v310_v12, 0.0  ;;  %v334_v21 = vsel %vm324_vm0, %v311_v14, 0.0  ;;  %v340_v28 = vsel %vm324_vm0, %v313_v23, 0.0  ;;  %v337_v29 = vsel %vm324_vm0, %v312_v24, 0.0  ;;  %s1041_s25 = scalar_lea.vmem %s1040_s3, 256  ;;  %p1042_p4 = scmp.lt.s32.totalorder %s1525_s11, %s1040_s3 }
  0x26   : > { %v325_v18 = vsel %vm324_vm0, %v308_v13, 0.0  ;;  %332 = vadd.xlane.f32.xlu1 %v331_v17  ;;  %v328_v22 = vsel %vm324_vm0, %v309_v15, 0.0  ;;  %v900_v30 = vunpack.c.h.bf16 %v948_v25  ;;  %v899_v31 = vunpack.c.l.bf16 %v948_v25  ;;  %v955_v15 = vld [vmem:[%s1239_s16 + $0x58] sm:$0xff]  }
  0x27   : > { %326 = vadd.xlane.f32.xlu0 %v325_v18  ;;  %v346_v33 = vsel %vm324_vm0, %v315_v26, 0.0  ;;  %v343_v34 = vsel %vm324_vm0, %v314_v27, 0.0  ;;  %v904_v37 = vunpack.c.h.bf16 %v949_v32  ;;  %v903_v38 = vunpack.c.l.bf16 %v949_v32 }
  0x28   : > { %v317_v35 = vmul.f32 %v900_v30, %v1253_v1  ;;  %v316_v36 = vmul.f32 %v899_v31, %v1253_v1  ;;  %v908_v40 = vunpack.c.h.bf16 %v950_v39  ;;  %v907_v41 = vunpack.c.l.bf16 %v950_v39  ;;  %v957_v30 = vld [vmem:[%s1239_s16 + $0x68] sm:$0xff]  }
  0x29   : > { %v319_v44 = vmul.f32 %v904_v37, %v1253_v1  ;;  %v318_v45 = vmul.f32 %v903_v38, %v1253_v1  ;;  %v912_v47 = vunpack.c.h.bf16 %v951_v46  ;;  %v911_v48 = vunpack.c.l.bf16 %v951_v46 }
  0x2a   : > { %335 = vadd.xlane.f32.xlu1 %v334_v21  ;;  %v352_v42 = vsel %vm324_vm0, %v317_v35, 0.0  ;;  %v349_v43 = vsel %vm324_vm0, %v316_v36, 0.0  ;;  %v321_v51 = vmul.f32 %v908_v40, %v1253_v1  ;;  %v320_v52 = vmul.f32 %v907_v41, %v1253_v1 }
  0x2b   : > { %329 = vadd.xlane.f32.xlu0 %v328_v22  ;;  %v358_v49 = vsel %vm324_vm0, %v319_v44, 0.0  ;;  %v355_v50 = vsel %vm324_vm0, %v318_v45, 0.0  ;;  %v323_v54 = vmul.f32 %v912_v47, %v1253_v1  ;;  %v915_v55 = vunpack.c.l.bf16 %v952_v53  ;;  %v956_v22 = vld [vmem:[%s1239_s16 + $0x60] sm:$0xff]  }
  0x2c   : > { %v364_v56 = vsel %vm324_vm0, %v321_v51, 0.0  ;;  %v361_v57 = vsel %vm324_vm0, %v320_v52, 0.0  ;;  %v322_v58 = vmul.f32 %v911_v48, %v1253_v1  ;;  %v916_v59 = vunpack.c.h.bf16 %v952_v53  ;;  %v391_v52 = vld [vmem:[%s1244_s30 + $0x8] sm:$0xff]  ;;  %v392_v53 = vld [vmem:[%s1244_s30 + $0x10] sm:$0xff] }
  0x2d   : > { %v370_v62 = vsel %vm324_vm0, %v323_v54, 0.0  ;;  %v535_v63 = vmul.f32 %v915_v55, %v1253_v1  ;;  %v944_v0 = vunpack.c.h.bf16 %v1296_v61  ;;  %v920_v4 = vunpack.c.h.bf16 %v953_v60  ;;  %v393_v54 = vld [vmem:[%s1244_s30 + $0x18] sm:$0xff]  ;;  %v390_v55 = vld [vmem:[%s1244_s30] sm:$0xff] }
  0x2e   : > { %341 = vadd.xlane.f32.xlu1 %v340_v28  ;;  %v367_v2 = vsel %vm324_vm0, %v322_v58, 0.0  ;;  %v536_v3 = vmul.f32 %v916_v59, %v1253_v1  ;;  %v919_v5 = vunpack.c.l.bf16 %v953_v60  ;;  %v924_v8 = vunpack.c.h.bf16 %v954_v6  ;;  %v401_v58 = vld [vmem:[%s1244_s30 + $0x58] sm:$0xff]  ;;  %v396_v59 = vld [vmem:[%s1244_s30 + $0x30] sm:$0xff]  ;;  %v403_v60 = vld [vmem:[%s1244_s30 + $0x68] sm:$0xff] }
  0x2f   : > { %338 = vadd.xlane.f32.xlu0 %v337_v29  ;;  %v550_v7 = vmul.f32 %v944_v0, %v1253_v1  ;;  %v923_v9 = vunpack.c.l.bf16 %v954_v6  ;;  %v551_v11 = vsel %vm324_vm0, %v535_v63, 0.0  ;;  %v538_v13 = vmul.f32 %v920_v4, %v1253_v1  ;;  %v958_v29 = vld [vmem:[%s1239_s16 + $0x70] sm:$0xff]   ;;  %v398_v63 = vld [vmem:[%s1244_s30 + $0x40] sm:$0xff]  ;;  %s1035_s16 = scalar_lea.vmem %s1525_s11, 128 }
  0x30   : > { %v554_v12 = vsel %vm324_vm0, %v536_v3, 0.0  ;;  %v537_v14 = vmul.f32 %v919_v5, %v1253_v1  ;;  %v540_v16 = vmul.f32 %v924_v8, %v1253_v1  ;;  %v927_v17 = vunpack.c.l.bf16 %v955_v15  ;;  %v861_v0 = vld [vmem:[%s1244_s30 + $0x80] sm:$0xff]  ;;  %v863_v3 = vld [vmem:[%s1244_s30 + $0x90] sm:$0xff]  ;;  %v862_v8 = vld [vmem:[%s1244_s30 + $0x88] sm:$0xff]  ;;  %p1036_p0 = scmp.ne.s32.totalorder %s1525_s11, %s1035_s16  ;;  %p1043_p5 = scmp.lt.s32.totalorder %s1041_s25, %s1035_s16 }
  0x31   : > { %v1306_v10 = vsel %vm324_vm0, %v550_v7, 0.0  ;;  %v560_v18 = vsel %vm324_vm0, %v538_v13, 0.0  ;;  %v539_v20 = vmul.f32 %v923_v9, %v1253_v1  ;;  %v928_v21 = vunpack.c.h.bf16 %v955_v15  ;;  %v402_v4 = vld [vmem:[%s1244_s30 + $0x60] sm:$0xff]  ;;  %v404_v6 = vld [vmem:[%s1244_s30 + $0x70] sm:$0xff]  ;;  %v866_v7 = vld [vmem:[%s1244_s30 + $0xa8] sm:$0xff] }
  0x32   : > { %347 = vadd.xlane.f32.xlu1 %v346_v33  ;;  %v557_v19 = vsel %vm324_vm0, %v537_v14, 0.0  ;;  %v541_v23 = vmul.f32 %v927_v17, %v1253_v1  ;;  %v932_v24 = vunpack.c.h.bf16 %v956_v22  ;;  %v566_v25 = vsel %vm324_vm0, %v540_v16, 0.0  ;;  %v865_v5 = vld [vmem:[%s1244_s30 + $0xa0] sm:$0xff]  ;;  %v868_v9 = vld [vmem:[%s1244_s30 + $0xb8] sm:$0xff]  ;;  %v867_v13 = vld [vmem:[%s1244_s30 + $0xb0] sm:$0xff]  ;;  %p1037_p1 = pnand %p1036_p0, %p1211_p3  ;;  %p1044_p6 = por %p1043_p5, %p1042_p4 }
  0x33   : > { %344 = vadd.xlane.f32.xlu0 %v343_v34  ;;  %v563_v26 = vsel %vm324_vm0, %v539_v20, 0.0  ;;  %v542_v27 = vmul.f32 %v928_v21, %v1253_v1  ;;  %v931_v28 = vunpack.c.l.bf16 %v956_v22  ;;  %v939_v35 = vunpack.c.l.bf16 %v958_v29  ;;  %v871_v14 = vld [vmem:[%s1244_s30 + $0xd0] sm:$0xff]  ;;  %v870_v15 = vld [vmem:[%s1244_s30 + $0xc8] sm:$0xff]  ;;  %v872_v16 = vld [vmem:[%s1244_s30 + $0xd8] sm:$0xff] }
  0x34   : > { %v569_v31 = vsel %vm324_vm0, %v541_v23, 0.0  ;;  %v544_v32 = vmul.f32 %v932_v24, %v1253_v1  ;;  %v935_v36 = vunpack.c.l.bf16 %v957_v30  ;;  %v943_v37 = vunpack.c.l.bf16 %v1296_v61  ;;  %v397_v61 = vld [vmem:[%s1244_s30 + $0x38] sm:$0xff]  ;;  %v873_v17 = vld [vmem:[%s1244_s30 + $0xe0] sm:$0xff]  ;;  %p1038_p2 = pneg %p1037_p1 }
  0x35   : > { %v572_v33 = vsel %vm324_vm0, %v542_v27, 0.0  ;;  %v543_v34 = vmul.f32 %v931_v28, %v1253_v1  ;;  %v936_v38 = vunpack.c.h.bf16 %v957_v30  ;;  %v547_v41 = vmul.f32 %v939_v35, %v1253_v1  ;;  %v876_v21 = vld [vmem:[%s1244_s30 + $0xf8] sm:$0xff] }
  0x36   : > { %353 = vadd.xlane.f32.xlu1 %v352_v42  ;;  %v578_v39 = vsel %vm324_vm0, %v544_v32, 0.0  ;;  %v545_v42 = vmul.f32 %v935_v36, %v1253_v1  ;;  %v549_v46 = vmul.f32 %v943_v37, %v1253_v1  ;;  %p1045_p7 = pnand %p1044_p6, %p1038_p2 }
  0x37   : > { %350 = vadd.xlane.f32.xlu0 %v349_v43  ;;  %v575_v40 = vsel %vm324_vm0, %v543_v34, 0.0  ;;  %v940_v43 = vunpack.c.h.bf16 %v958_v29  ;;  %v587_v44 = vsel %vm324_vm0, %v547_v41, 0.0  ;;  %v546_v47 = vmul.f32 %v936_v38, %v1253_v1  ;;  %v874_v38 = vld [vmem:[%s1244_s30 + $0xe8] sm:$0xff] }
  0x38   : > { %v581_v45 = vsel %vm324_vm0, %v545_v42, 0.0  ;;  %v593_v48 = vsel %vm324_vm0, %v549_v46, 0.0 }
  0x3a   : > { %359 = vadd.xlane.f32.xlu1 %v358_v49  ;;  %v584_v49 = vsel %vm324_vm0, %v546_v47, 0.0 }
  0x3b   : > { %356 = vadd.xlane.f32.xlu0 %v355_v50  ;;  %v548_v50 = vmul.f32 %v940_v43, %v1253_v1  ;;  %v394_v1 = vld [vmem:[%s1244_s30 + $0x20] sm:$0xff] }
  0x3d   : > { %v590_v51 = vsel %vm324_vm0, %v548_v50, 0.0  ;;  %v268_v50 = vlaneseq }
  0x3e   : > { %365 = vadd.xlane.f32.xlu1 %v364_v56  ;;  %v399_v56 = vld [vmem:[%s1244_s30 + $0x48] sm:$0xff] }
  0x3f   : > { %362 = vadd.xlane.f32.xlu0 %v361_v57  ;;  %v395_v57 = vld [vmem:[%s1244_s30 + $0x28] sm:$0xff] }
  0x42   : > { %371 = vadd.xlane.f32.xlu1 %v370_v62  ;;  %v405_v62 = vld [vmem:[%s1244_s30 + $0x78] sm:$0xff] }
  0x43   : > { %368 = vadd.xlane.f32.xlu0 %v367_v2  ;;  %v400_v2 = vld [vmem:[%s1244_s30 + $0x50] sm:$0xff] }
  0x46   : > { %552 = vadd.xlane.f32.xlu1 %v551_v11  ;;  %v864_v11 = vld [vmem:[%s1244_s30 + $0x98] sm:$0xff] }
  0x47   : > { %555 = vadd.xlane.f32.xlu0 %v554_v12  ;;  %v869_v12 = vld [vmem:[%s1244_s30 + $0xc0] sm:$0xff] }
  0x4a   : > { %561 = vadd.xlane.f32.xlu1 %v560_v18  ;;  %v875_v18 = vld [vmem:[%s1244_s30 + $0xf0] sm:$0xff] }
  0x4b   : > { %558 = vadd.xlane.f32.xlu0 %v557_v19 }
  0x4e   : > { %567 = vadd.xlane.f32.xlu1 %v566_v25 }
  0x4f   : > { %564 = vadd.xlane.f32.xlu0 %v563_v26 }
  0x52   : > { %570 = vadd.xlane.f32.xlu1 %v569_v31 }
  0x53   : > { %573 = vadd.xlane.f32.xlu0 %v572_v33 }
  0x56   : > { %579 = vadd.xlane.f32.xlu1 %v578_v39 }
  0x57   : > { %576 = vadd.xlane.f32.xlu0 %v575_v40 }
  0x5a   : > { %588 = vadd.xlane.f32.xlu1 %v587_v44 }
  0x5b   : > { %582 = vadd.xlane.f32.xlu0 %v581_v45 }
  0x5e   : > { %594 = vadd.xlane.f32.xlu1 %v593_v48 }
  0x5f   : > { %585 = vadd.xlane.f32.xlu0 %v584_v49 }
  0x63   : > { %591 = vadd.xlane.f32.xlu0 %v590_v51 }
  0x6f   : > { %410 = vperm.xlu1 %1034, %v391_v52   ;;  %v1420_v52 = vand.u32 127, %v268_v50 }
  0x73   : > { %413 = vperm.xlu1 %1034, %v392_v53  }
  0x77   : > { %416 = vperm.xlu1 %1034, %v393_v54  }
  0x79   : > { %407 = vperm.xlu0 %1033, %v390_v55   ;;  %v1424_v55 = vstv %s267_s20 }
  0x7b   : > { %419 = vperm.xlu1 %1034, %v394_v1  }
  0x7d   : > { %434 = vperm.xlu0 %1033, %v399_v56  }
  0x7f   : > { %422 = vperm.xlu1 %1034, %v395_v57  }
  0x81   : > { %440 = vperm.xlu0 %1033, %v401_v58  }
  0x83   : > { %425 = vperm.xlu1 %1034, %v396_v59  }
  0x85   : > { %446 = vperm.xlu0 %1033, %v403_v60  }
  0x87   : > { %428 = vperm.xlu1 %1034, %v397_v61  }
  0x89   : > { %452 = vperm.xlu0 %1033, %v405_v62  }
  0x8b   : > { %431 = vperm.xlu1 %1034, %v398_v63  }
  0x8d   : > { %633 = vperm.xlu0 %1033, %v861_v0  }
  0x8f   : > { %437 = vperm.xlu1 %1034, %v400_v2  }
  0x91   : > { %639 = vperm.xlu0 %1033, %v863_v3  }
  0x93   : > { %443 = vperm.xlu1 %1034, %v402_v4  }
  0x95   : > { %645 = vperm.xlu0 %1033, %v865_v5  }
  0x97   : > { %449 = vperm.xlu1 %1034, %v404_v6  }
  0x99   : > { %648 = vperm.xlu0 %1033, %v866_v7  }
  0x9b   : > { %636 = vperm.xlu1 %1034, %v862_v8  }
  0x9d   : > { %654 = vperm.xlu0 %1033, %v868_v9  }
  0x9f   : > { %642 = vperm.xlu1 %1034, %v864_v11  }
  0xa1   : > { %657 = vperm.xlu0 %1033, %v869_v12  }
  0xa3   : > { %651 = vperm.xlu1 %1034, %v867_v13  }
  0xa5   : > { %663 = vperm.xlu0 %1033, %v871_v14  }
  0xa7   : > { %660 = vperm.xlu1 %1034, %v870_v15  }
  0xab   : > { %666 = vperm.xlu1 %1034, %v872_v16  }
  0xaf   : > { %669 = vperm.xlu1 %1034, %v873_v17  }
  0xb3   : > { %675 = vperm.xlu1 %1034, %v875_v18   ;;  %v333_v19 = vpop.xlane.xlu1 %332 }
  0xb4   : > { %v327_v20 = vpop.xlane.xlu0 %326  ;;  %v376_v59 = vadd.f32 %v1424_v55, %v333_v19 }
  0xb5   : > { %v374_v1 = vadd.f32 %v1424_v55, %v327_v20 }
  0xb7   : > { %678 = vperm.xlu1 %1034, %v876_v21   ;;  %v336_v22 = vpop.xlane.xlu1 %335 }
  0xb8   : > { %v330_v23 = vpop.xlane.xlu0 %329  ;;  %v377_v63 = vadd.f32 %v1424_v55, %v336_v22 }
  0xb9   : > { %v375_v56 = vadd.f32 %v1424_v55, %v330_v23 }
  0xbb   : > { %v342_v24 = vpop.xlane.xlu1 %341 }
  0xbc   : > { %v339_v25 = vpop.xlane.xlu0 %338  ;;  %v379_v8 = vadd.f32 %v1424_v55, %v342_v24 }
  0xbd   : > { %v378_v5 = vadd.f32 %v1424_v55, %v339_v25 }
  0xbf   : > { %v1372_v26 = vpop.xlane.xlu1 %347 }
  0xc0   : > { %v345_v27 = vpop.xlane.xlu0 %344  ;;  %v381_v21 = vadd.f32 %v1424_v55, %v1372_v26 }
  0xc1   : > { %v380_v16 = vadd.f32 %v1424_v55, %v345_v27 }
  0xc3   : > { %v1374_v28 = vpop.xlane.xlu1 %353 }
  0xc4   : > { %597 = vadd.xlane.f32.xlu0 %v1306_v10  ;;  %v1377_v29 = vpop.xlane.xlu0 %350 }
  0xc7   : > { %v1379_v30 = vpop.xlane.xlu1 %359 }
  0xc8   : > { %v1381_v31 = vpop.xlane.xlu0 %356 }
  0xcb   : > { %v1383_v32 = vpop.xlane.xlu1 %365 }
  0xcc   : > { %v1385_v33 = vpop.xlane.xlu0 %362 }
  0xcf   : > { %v1387_v34 = vpop.xlane.xlu1 %371 }
  0xd0   : > { %v1389_v35 = vpop.xlane.xlu0 %368 }
  0xd3   : > { %v1391_v36 = vpop.xlane.xlu1 %552 }
  0xd4   : > { %v1393_v37 = vpop.xlane.xlu0 %555 }
  0xd7   : > { %v1396_v10 = vpop.xlane.xlu1 %561 }
  0xd8   : > { %v1398_v39 = vpop.xlane.xlu0 %558 }
  0xda   : > { %672 = vperm.xlu0 %1033, %v874_v38   ;;  %v382_v38 = vadd.f32 %v1424_v55, %v1377_v29 }
  0xdb   : > { %v1400_v40 = vpop.xlane.xlu1 %567 }
  0xdc   : > { %v1402_v41 = vpop.xlane.xlu0 %564 }
  0xdf   : > { %v1404_v42 = vpop.xlane.xlu1 %570 }
  0xe0   : > { %v1406_v43 = vpop.xlane.xlu0 %573 }
  0xe3   : > { %v1408_v44 = vpop.xlane.xlu1 %579 }
  0xe4   : > { %v1410_v45 = vpop.xlane.xlu0 %576 }
  0xe7   : > { %v1412_v46 = vpop.xlane.xlu1 %588 }
  0xe8   : > { %v1414_v47 = vpop.xlane.xlu0 %582 }
  0xeb   : > { %v1416_v48 = vpop.xlane.xlu1 %594 }
  0xec   : > { %v1418_v49 = vpop.xlane.xlu0 %585 }
  0xef   : > { %v411_v51 = vpop.permute.xlu1 %410 }
  0xf0   : > { %v1422_v53 = vpop.xlane.xlu0 %591  ;;  %vm455_vm1 = vcmp.eq.s32.totalorder %v1420_v52, %v411_v51  ;;  %v383_v51 = vadd.f32 %v1424_v55, %v1374_v28  ;;  %v386_v28 = vadd.f32 %v1424_v55, %v1385_v33 }
  0xf1   : > { %v471_v60 = vsel %vm455_vm1, %v375_v56, 0.0 }
  0xf3   : > { %v414_v54 = vpop.permute.xlu1 %413 }
  0xf4   : > { %vm456_vm2 = vcmp.eq.s32.totalorder %v1420_v52, %v414_v54 }
  0xf5   : > { %v472_v0 = vsel %vm456_vm2, %v376_v59, 0.0  ;;  %v385_v59 = vadd.f32 %v1424_v55, %v1379_v30  ;;  %v388_v30 = vadd.f32 %v1424_v55, %v1389_v35  ;;  %v600_v35 = vadd.f32 %v1393_v37, %v1424_v55 }
  0xf7   : > { %v417_v57 = vpop.permute.xlu1 %416 }
  0xf8   : > { %v408_v58 = vpop.permute.xlu0 %407  ;;  %vm457_vm4 = vcmp.eq.s32.totalorder %v1420_v52, %v417_v57 }
  0xf9   : > { %vm454_vm3 = vcmp.eq.s32.totalorder %v1420_v52, %v408_v58  ;;  %v473_v6 = vsel %vm457_vm4, %v377_v63, 0.0 }
  0xfa   : > { %v470_v61 = vsel %vm454_vm3, %v374_v1, 0.0  ;;  %v384_v1 = vadd.f32 %v1424_v55, %v1381_v31 }
  0xfb   : > { %v486_v62 = vadd.f32 %v471_v60, %v470_v61  ;;  %v420_v2 = vpop.permute.xlu1 %419 }
  0xfc   : > { %v435_v3 = vpop.permute.xlu0 %434  ;;  %vm458_vm5 = vcmp.eq.s32.totalorder %v1420_v52, %v420_v2  ;;  %v387_v2 = vadd.f32 %v1424_v55, %v1383_v32 }
  0xfd   : > { %v487_v4 = vadd.f32 %v486_v62, %v472_v0  ;;  %v474_v9 = vsel %vm458_vm5, %v378_v5, 0.0  ;;  %vm463_vm9 = vcmp.eq.s32.totalorder %v1420_v52, %v435_v3 }
  0xfe   : > { %v479_v56 = vsel %vm463_vm9, %v383_v51, 0.0  ;;  %v606_v51 = vadd.f32 %v1406_v43, %v1424_v55 }
  0xff   : > { %v488_v7 = vadd.f32 %v487_v4, %v473_v6  ;;  %v423_v11 = vpop.permute.xlu1 %422 }
 0x100   : > { %v441_v12 = vpop.permute.xlu0 %440  ;;  %vm459_vm6 = vcmp.eq.s32.totalorder %v1420_v52, %v423_v11  ;;  %v599_v11 = vadd.f32 %v1391_v36, %v1424_v55  ;;  %v602_v36 = vadd.f32 %v1396_v10, %v1424_v55 }
 0x101   : > { %v489_v13 = vadd.f32 %v488_v7, %v474_v9  ;;  %v475_v14 = vsel %vm459_vm6, %v379_v8, 0.0  ;;  %vm465_vm11 = vcmp.eq.s32.totalorder %v1420_v52, %v441_v12  ;;  %v389_v8 = vadd.f32 %v1424_v55, %v1387_v34 }
 0x102   : > { %v481_v62 = vsel %vm465_vm11, %v385_v59, 0.0  ;;  %v601_v34 = vadd.f32 %v1398_v39, %v1424_v55 }
 0x103   : > { %v490_v15 = vadd.f32 %v489_v13, %v475_v14  ;;  %v426_v17 = vpop.permute.xlu1 %425 }
 0x104   : > { %v447_v18 = vpop.permute.xlu0 %446  ;;  %vm460_vm7 = vcmp.eq.s32.totalorder %v1420_v52, %v426_v17 }
 0x105   : > { %v476_v19 = vsel %vm460_vm7, %v380_v16, 0.0  ;;  %vm467_vm13 = vcmp.eq.s32.totalorder %v1420_v52, %v447_v18 }
 0x106   : > { %v491_v20 = vadd.f32 %v490_v15, %v476_v19  ;;  %v483_v5 = vsel %vm467_vm13, %v387_v2, 0.0 }
 0x107   : > { %v429_v22 = vpop.permute.xlu1 %428 }
 0x108   : > { %v453_v23 = vpop.permute.xlu0 %452  ;;  %vm461_vm8 = vcmp.eq.s32.totalorder %v1420_v52, %v429_v22 }
 0x109   : > { %v477_v24 = vsel %vm461_vm8, %v381_v21, 0.0  ;;  %vm469_vm15 = vcmp.eq.s32.totalorder %v1420_v52, %v453_v23  ;;  %v603_v21 = vadd.f32 %v1402_v41, %v1424_v55  ;;  %v604_v23 = vadd.f32 %v1400_v40, %v1424_v55 }
 0x10a   : > { %v492_v25 = vadd.f32 %v491_v20, %v477_v24  ;;  %v485_v12 = vsel %vm469_vm15, %v389_v8, 0.0 }
 0x10b   : > { %v432_v50 = vpop.permute.xlu1 %431 }
 0x10c   : > { %v634_v27 = vpop.permute.xlu0 %633  ;;  %vm462_vm10 = vcmp.eq.s32.totalorder %v1420_v52, %v432_v50  ;;  %v605_v50 = vadd.f32 %v1404_v42, %v1424_v55  ;;  %v608_v42 = vadd.f32 %v1408_v44, %v1424_v55  ;;  %v611_v44 = vadd.f32 %v1412_v46, %v1424_v55 }
 0x10d   : > { %v478_v54 = vsel %vm462_vm10, %v382_v38, 0.0  ;;  %vm680_vm1 = vcmp.eq.s32.totalorder %v1420_v52, %v634_v27  ;;  %v613_v46 = vadd.f32 %v1416_v48, %v1424_v55 }
 0x10e   : > { %v493_v26 = vadd.f32 %v492_v25, %v478_v54  ;;  %v696_v15 = vsel %vm680_vm1, %v599_v11, 0.0 }
 0x10f   : > { %v438_v57 = vpop.permute.xlu1 %437 }
 0x110   : > { %v640_v58 = vpop.permute.xlu0 %639  ;;  %vm464_vm12 = vcmp.eq.s32.totalorder %v1420_v52, %v438_v57  ;;  %v494_v29 = vadd.f32 %v493_v26, %v479_v56 }
 0x111   : > { %v480_v60 = vsel %vm464_vm12, %v384_v1, 0.0  ;;  %vm682_vm2 = vcmp.eq.s32.totalorder %v1420_v52, %v640_v58  ;;  %v607_v1 = vadd.f32 %v1410_v45, %v1424_v55  ;;  %v610_v45 = vadd.f32 %v1418_v49, %v1424_v55 }
 0x112   : > { %v495_v61 = vadd.f32 %v494_v29, %v480_v60  ;;  %v698_v19 = vsel %vm682_vm2, %v601_v34, 0.0  ;;  %v609_v60 = vadd.f32 %v1414_v47, %v1424_v55 }
 0x113   : > { %v444_v63 = vpop.permute.xlu1 %443 }
 0x114   : > { %v646_v0 = vpop.permute.xlu0 %645  ;;  %vm466_vm14 = vcmp.eq.s32.totalorder %v1420_v52, %v444_v63  ;;  %v496_v31 = vadd.f32 %v495_v61, %v481_v62 }
 0x115   : > { %v482_v3 = vsel %vm466_vm14, %v386_v28, 0.0  ;;  %vm684_vm4 = vcmp.eq.s32.totalorder %v1420_v52, %v646_v0 }
 0x116   : > { %v497_v4 = vadd.f32 %v496_v31, %v482_v3  ;;  %v700_v24 = vsel %vm684_vm4, %v603_v21, 0.0 }
 0x117   : > { %v450_v6 = vpop.permute.xlu1 %449 }
 0x118   : > { %v649_v7 = vpop.permute.xlu0 %648  ;;  %vm468_vm0 = vcmp.eq.s32.totalorder %v1420_v52, %v450_v6  ;;  %v498_v33 = vadd.f32 %v497_v4, %v483_v5  ;;  %v612_v5 = vadd.f32 %v1422_v53, %v1424_v55 }
 0x119   : > { %v484_v9 = vsel %vm468_vm0, %v388_v30, 0.0  ;;  %vm685_vm6 = vcmp.eq.s32.totalorder %v1420_v52, %v649_v7 }
 0x11a   : > { %v499_v32 = vadd.f32 %v498_v33, %v484_v9  ;;  %v701_v27 = vsel %vm685_vm6, %v604_v23, 0.0 }
 0x11b   : > { %v637_v13 = vpop.permute.xlu1 %636 }
 0x11c   : > { %v1473_v14 = vadd.f32 %v499_v32, %v485_v12  ;;  %vm681_vm3 = vcmp.eq.s32.totalorder %v1420_v52, %v637_v13  ;;  %v655_v17 = vpop.permute.xlu0 %654 }
 0x11d   : > { %v697_v16 = vsel %vm681_vm3, %v600_v35, 0.0  ;;  %vm687_vm8 = vcmp.eq.s32.totalorder %v1420_v52, %v655_v17  ;;  %v728_v35 = vld [vmem:[%s1246_s5] sm:$0xff] }
 0x11e   : > { %v712_v18 = vadd.f32 %v697_v16, %v696_v15  ;;  %v703_v56 = vsel %vm687_vm8, %v606_v51, 0.0 }
 0x11f   : > { %v643_v37 = vpop.permute.xlu1 %642 }
 0x120   : > { %vm683_vm5 = vcmp.eq.s32.totalorder %v1420_v52, %v643_v37  ;;  %v713_v20 = vadd.f32 %v712_v18, %v698_v19  ;;  %v658_v25 = vpop.permute.xlu0 %657 }
 0x121   : > { %v699_v22 = vsel %vm683_vm5, %v602_v36, 0.0  ;;  %vm688_vm9 = vcmp.eq.s32.totalorder %v1420_v52, %v658_v25 }
 0x122   : > { %v714_v39 = vadd.f32 %v713_v20, %v699_v22  ;;  %v704_v29 = vsel %vm688_vm9, %v607_v1, 0.0 }
 0x123   : > { %v652_v10 = vpop.permute.xlu1 %651 }
 0x124   : > { %v715_v38 = vadd.f32 %v714_v39, %v700_v24  ;;  %vm686_vm7 = vcmp.eq.s32.totalorder %v1420_v52, %v652_v10  ;;  %v664_v57 = vpop.permute.xlu0 %663 }
 0x125   : > { %v702_v54 = vsel %vm686_vm7, %v605_v50, 0.0  ;;  %vm690_vm11 = vcmp.eq.s32.totalorder %v1420_v52, %v664_v57 }
 0x126   : > { %v716_v41 = vadd.f32 %v715_v38, %v701_v27  ;;  %v706_v62 = vsel %vm690_vm11, %v609_v60, 0.0 }
 0x127   : > { %v661_v26 = vpop.permute.xlu1 %660 }
 0x128   : > { %v717_v40 = vadd.f32 %v716_v41, %v702_v54  ;;  %vm689_vm10 = vcmp.eq.s32.totalorder %v1420_v52, %v661_v26 }
 0x129   : > { %v705_v61 = vsel %vm689_vm10, %v608_v42, 0.0 }
 0x12a   : > { %v718_v58 = vadd.f32 %v717_v40, %v703_v56 }
 0x12b   : > { %v667_v59 = vpop.permute.xlu1 %666 }
 0x12c   : > { %v719_v43 = vadd.f32 %v718_v58, %v704_v29  ;;  %vm691_vm12 = vcmp.eq.s32.totalorder %v1420_v52, %v667_v59 }
 0x12d   : > { %v707_v31 = vsel %vm691_vm12, %v610_v45, 0.0 }
 0x12e   : > { %v720_v28 = vadd.f32 %v719_v43, %v705_v61 }
 0x12f   : > { %v670_v63 = vpop.permute.xlu1 %669 }
 0x130   : > { %v721_v0 = vadd.f32 %v720_v28, %v706_v62  ;;  %vm692_vm13 = vcmp.eq.s32.totalorder %v1420_v52, %v670_v63 }
 0x131   : > { %v708_v3 = vsel %vm692_vm13, %v611_v44, 0.0 }
 0x132   : > { %v722_v2 = vadd.f32 %v721_v0, %v707_v31 }
 0x133   : > { %v676_v47 = vpop.permute.xlu1 %675 }
 0x134   : > { %v723_v4 = vadd.f32 %v722_v2, %v708_v3  ;;  %vm694_vm14 = vcmp.eq.s32.totalorder %v1420_v52, %v676_v47 }
 0x135   : > { %v710_v9 = vsel %vm694_vm14, %v613_v46, 0.0 }
 0x137   : > { %v679_v6 = vpop.permute.xlu1 %678 }
 0x138   : > { %vm695_vm0 = vcmp.eq.s32.totalorder %v1420_v52, %v679_v6 }
 0x151   : > { %v598_v30 = vpop.xlane.xlu0 %597 }
 0x152   : > { %v614_v7 = vadd.f32 %v598_v30, %v1424_v55 }
 0x154   : > { %v711_v32 = vsel %vm695_vm0, %v614_v7, 0.0 }
 0x159   : > { %v673_v49 = vpop.permute.xlu0 %672 }
 0x15a   : > { %vm693_vm15 = vcmp.eq.s32.totalorder %v1420_v52, %v673_v49 }
 0x15b   : > { %v709_v33 = vsel %vm693_vm15, %v612_v5, 0.0 }
 0x15c   : > { %v724_v8 = vadd.f32 %v723_v4, %v709_v33 }
 0x15e   : > { %v725_v53 = vadd.f32 %v724_v8, %v710_v9 }
 0x160   : > { %v726_v11 = vadd.f32 %v725_v53, %v711_v32 }
 0x162   : > { %v727_v12 = vadd.f32 %v726_v11, %v1473_v14 }
 0x164   : > { %v729_v48 = vadd.f32 %v728_v35, %v727_v12 }
 0x166   : > { %730 = vst [vmem:[%s1246_s5] sm:$0xff] %v729_v48 }
 0x167   : > { %1048 = shalt.err (!%p1045_p7)
}
 0x168   : > { %s1049_s7 = scalar_lea.hbm %s1523_s14, 128  ;;  %s1053_s8 = scalar_lea.hbm %s1583_s4, 256 }
 0x169   : > { %p1050_p8 = scmp.ne.s32.totalorder %s1523_s14, %s1049_s7  ;;  %p1054_p12 = scmp.lt.u32.totalorder %s1523_s14, %s1583_s4 }
 0x16a   : > { %p1055_p13 = scmp.lt.u32.totalorder %s1053_s8, %s1049_s7  ;;  %p1057_p1 = scmp.lt.u32.totalorder %s1049_s7, %s1523_s14 }
 0x16b   : > { %p1051_p10 = pnand %p1050_p8, %p1211_p3 }
 0x16c   : > { %p1056_p0 = por %p1055_p13, %p1054_p12 }
 0x16d   : > { %p1052_p11 = pneg %p1051_p10 }
 0x16e   : > { %p1058_p2 = por %p1057_p1, %p1056_p0 }
 0x170   : > { %p1059_p4 = pnand %p1058_p2, %p1052_p11 }
 0x172   : > { %1062 = shalt.err (!%p1059_p4)
}
 0x173   : > { %960 = dma.vmem_to_hbm [thread:$0]  (%p1211_p3), %s1525_s11, 128, %s1523_s14, %s732_s15  }
 0x174 PF: > { %p966_p5 = scmp.ge.s32.totalorder %s1129_s24, 2  ;;  %s757_s9 = sand.u32 1, %s1101_s17  }
 0x175   : > { %s758_s12 = scalar_lea.sflag [#allocation4], %s757_s9 }
 0x176   : > { %p963_p6 = pnand %p966_p5, %p1221_p9 }
 0x178   : > { %1096 = dma.done.wait (!%p963_p6), %s758_s12, 128  }
 0x179   : > { %1098 = vsyncadd (!%p963_p6), %s758_s12, 4294967168  ;;  %s18_s24 = sadd.s32 1, %s1129_s24   ;;  %s1586_s17 = smov %s1105_s18 }
 0x17a   : > { %p15_p7 = scmp.ge.s32.totalorder %s18_s24, 6   ;;  %s1587_s18 = smov %s1109_s19 }
 0x17b   : > { %s1588_s19 = smov %s1229_s6  ;;  %s1589_s20 = smov %s1121_s22 }
 0x17c   : > { %s1590_s21 = smov %s1125_s23  ;;  %s1591_s22 = smov %s1594_s26 }
 0x17d   : > { %s1592_s23 = smov %s1598_s27  ;;  %17 = sbr.rel (!%p15_p7) target bundleno = 7 (0x7), region = 80 }
 0x184   :  { %763 = vsyncpa [#allocation4], 1 }
 0x185   :  { %765 = vsyncpa [#allocation4 + $0x1], 1 }

</bundles_post_ra>
